<compile_context>
chip_gen: v7x
topology: tpu7x:2x2x1
jax: 0.10.0
libtpu: 0.0.40
codegen_flags: <defaults>
</compile_context>

<pallas_src>
import jax
import jax.numpy as jnp
from jax import lax
from jax.experimental import pallas as pl
from jax.experimental.pallas import tpu as pltpu


def _round_up(x, m):
    return ((x + m - 1) // m) * m


def _vmem_capacity_bytes():
    try:
        info = pltpu.get_tpu_info()
        cap = int(getattr(info, "vmem_capacity_bytes", 0))
        if cap > 0:
            return cap
    except Exception:
        pass
    return 64 * 2**20  # conservative fallback: assume v7x-sized VMEM


def _make_sgc_kernel(n_k, tk, rem):
    # Contract last dim of x (features) with last dim of W (features): x @ W^T.
    dn = (((1,), (1,)), ((), ()))

    if n_k == 1:
        # Full-K: no accumulator scratch, no init/finalize, single MXU call.
        def kernel(x_ref, w_ref, b_ref, o_ref):
            acc = lax.dot_general(x_ref[...], w_ref[...], dimension_numbers=dn,
                                  preferred_element_type=jnp.float32)
            o_ref[...] = (acc + b_ref[...]).astype(o_ref.dtype)
        return kernel

    def kernel(x_ref, w_ref, b_ref, o_ref, acc_ref):
        k = pl.program_id(1)

        @pl.when(k == 0)
        def _init():
            acc_ref[...] = jnp.zeros_like(acc_ref)

        xv = x_ref[...]
        if rem:
            # The last K tile of x extends past nfeat; its tail columns hold
            # whatever stale bits the DMA left in VMEM (could be NaN), so zero
            # them explicitly before the MXU.  (W is zero-padded in the
            # wrapper, but 0 * NaN is still NaN -> must mask x.)
            col = lax.broadcasted_iota(jnp.int32, xv.shape, dimension=1)
            limit = jnp.where(k == n_k - 1, rem, tk)
            xv = jnp.where(col < limit, xv, jnp.zeros_like(xv))

        acc_ref[...] += lax.dot_general(xv, w_ref[...], dimension_numbers=dn,
                                        preferred_element_type=jnp.float32)

        @pl.when(k == n_k - 1)
        def _finalize():
            o_ref[...] = (acc_ref[...] + b_ref[...]).astype(o_ref.dtype)

    return kernel


def sgc_forward(x, weight, bias, *, tm=None, tk=None):
    """SGC forward: y = x @ weight.T + bias.

    x:      (N, nfeat)   streamed directly in its own dtype (no wrapper copy).
    weight: (nclass, nfeat)
    bias:   (nclass,)
    Returns (N, nclass) in x.dtype (f32 accumulation, f32 bias add).
    """
    N, nfeat = x.shape
    nclass, nfeat_w = weight.shape
    assert nfeat_w == nfeat, "weight must be (nclass, nfeat)"
    out_dtype = x.dtype
    x_sz = jnp.dtype(x.dtype).itemsize
    out_sz = jnp.dtype(out_dtype).itemsize

    # W and b are tiny -> wrapper-side cast/reshape/pad of them is free.
    w_c = weight.astype(x.dtype)                       # (nclass, nfeat), K lane-dense
    b_c = bias.astype(jnp.float32).reshape(1, nclass)  # f32 bias add before out cast

    # ---- generation-aware VMEM budget --------------------------------------
    vmem_cap = _vmem_capacity_bytes()
    budget = min((vmem_cap * 3) // 4, 100 * 2**20)  # ~48 MiB (v7x) / ~96 MiB (v5e/v6e)

    # ---- row tile -----------------------------------------------------------
    if tm is None:
        tm = 2048 if x_sz <= 2 else 1024
    tm = _round_up(int(tm), 8)
    # Keep at least 2 row tiles so v7x's two TensorCores both get work on the
    # "parallel" axis (1-TC chips just see one extra ~0.35 us step).
    tm = max(8, min(tm, _round_up(pl.cdiv(N, 2), 8)))
    if tm >= N:
        tm = N  # single block equal to the full row extent (layout-legal)

    # ---- K tile -------------------------------------------------------------
    if tk is None or int(tk) >= nfeat:
        tk = nfeat                                   # prefer full-K (no acc, no K axis)
    else:
        tk = max(128, (int(tk) // 128) * 128)        # lane-aligned chunks
        if tk >= nfeat:
            tk = nfeat

    nclass_lane = _round_up(nclass, 128)             # out/acc blocks pad to 128 lanes
    nclass_sub = _round_up(nclass, 32 // min(x_sz, 4))

    def _n_k(tk_):
        return 1 if tk_ >= nfeat else -(-nfeat // tk_)

    def _footprint(tm_, tk_):
        fp = 2 * tm_ * tk_ * x_sz                    # x tile, double-buffered
        fp += 2 * nclass_sub * tk_ * x_sz            # W tile, double-buffered
        fp += 2 * tm_ * nclass_lane * out_sz         # out tile (lane-padded), dbl-buf
        fp += 2 * 8 * 128 * 4                        # bias
        if _n_k(tk_) > 1:
            fp += tm_ * nclass_lane * 4              # f32 accumulator scratch
        return fp

    # Shrink until the double-buffered footprint fits the budget: K tile first
    # (keep row tiles big for the parallel axis), then rows.
    while _footprint(tm, tk) > budget:
        new_tk = (tk // 2 // 128) * 128
        if 512 <= new_tk < nfeat:
            tk = new_tk
        elif tm > 256:
            tm = max(256, _round_up(tm // 2, 8))
        else:
            break

    n_k = _n_k(tk)
    rem = 0 if n_k == 1 else (nfeat % tk)
    nfeat_p = tk * n_k
    if nfeat_p != nfeat:
        # Pad only W (tiny).  x is NOT padded: its ragged last K tile is
        # masked in-kernel instead of paying a full extra HBM read+write of x.
        w_c = jnp.pad(w_c, ((0, 0), (0, nfeat_p - nfeat)))

    grid = (pl.cdiv(N, tm), n_k)

    in_specs = [
        pl.BlockSpec((tm, tk), lambda i, k: (i, k)),      # x row/K tile
        pl.BlockSpec((nclass, tk), lambda i, k: (0, k)),  # W K tile (resident when n_k==1)
        pl.BlockSpec((1, nclass), lambda i, k: (0, 0)),   # bias (resident)
    ]
    out_spec = pl.BlockSpec((tm, nclass), lambda i, k: (i, 0))
    scratch = [pltpu.VMEM((tm, nclass), jnp.float32)] if n_k > 1 else []

    fp = _footprint(tm, tk)
    vmem_limit = int(min(max(int(fp * 1.25), 32 * 2**20), budget))

    return pl.pallas_call(
        _make_sgc_kernel(n_k, tk, rem),
        out_shape=jax.ShapeDtypeStruct((N, nclass), out_dtype),
        grid_spec=pltpu.PrefetchScalarGridSpec(
            num_scalar_prefetch=0,
            grid=grid,
            in_specs=in_specs,
            out_specs=out_spec,
            scratch_shapes=scratch,
        ),
        compiler_params=pltpu.CompilerParams(
            dimension_semantics=("parallel", "arbitrary"),
            vmem_limit_bytes=vmem_limit,
        ),
    )(x, w_c, b_c)


if __name__ == "__main__":
    key = jax.random.PRNGKey(0)
    kx, kw, kb, kx2, kw2, kb2 = jax.random.split(key, 6)

    # SGC = logistic-regression head: N nodes, nfeat propagated features, nclass classes.
    N, nfeat, nclass = 128, 32, 8
    x = jax.random.normal(kx, (N, nfeat), dtype=jnp.float32)
    weight = jax.random.normal(kw, (nclass, nfeat), dtype=jnp.float32) * 0.1
    bias = jax.random.normal(kb, (nclass,), dtype=jnp.float32) * 0.1

    # 1) f32 path (full-K, no accumulator): matches the PyTorch reference.
    out = jax.block_until_ready(sgc_forward(x, weight, bias))
    ref = x @ weight.T + bias
    assert out.shape == (N, nclass)
    assert jnp.allclose(out, ref, atol=1e-5, rtol=1e-5), "f32 path mismatch"

    # 2) bf16 path: the CALLER supplies bf16 x (no wrapper-side cast of x).
    out_bf = jax.block_until_ready(sgc_forward(x.astype(jnp.bfloat16), weight, bias))
    ref_bf = (jnp.dot(x.astype(jnp.bfloat16), weight.T.astype(jnp.bfloat16),
                      preferred_element_type=jnp.float32) + bias).astype(jnp.bfloat16)
    assert out_bf.shape == (N, nclass)
    assert jnp.allclose(out_bf.astype(jnp.float32), ref_bf.astype(jnp.float32),
                        atol=2e-2, rtol=2e-2), "bf16 path mismatch"

    # 3) Ragged N + K-tiled accumulator + in-kernel masking of the K remainder
    #    (nfeat % tk != 0), exercising the path that replaces the old jnp.pad(x).
    N2, nfeat2, nclass2 = 200, 200, 16
    x2 = jax.random.normal(kx2, (N2, nfeat2), dtype=jnp.float32)
    w2 = jax.random.normal(kw2, (nclass2, nfeat2), dtype=jnp.float32) * 0.1
    b2 = jax.random.normal(kb2, (nclass2,), dtype=jnp.float32) * 0.1
    out2 = jax.block_until_ready(sgc_forward(x2, w2, b2, tm=64, tk=128))
    ref2 = x2 @ w2.T + b2
    assert out2.shape == (N2, nclass2)
    assert jnp.allclose(out2, ref2, atol=1e-3, rtol=1e-3), "K-tiled/masked path mismatch"

    print("KERNEL_OK")
</pallas_src>

<mosaic_0001>
module attributes {stable_mosaic.version = 11 : i64} {
  func.func @kernel(%arg0: i32, %arg1: i32, %arg2: memref<64x32xf32, #tpu.memory_space<vmem>>, %arg3: memref<8x32xf32, #tpu.memory_space<vmem>>, %arg4: memref<1x8xf32, #tpu.memory_space<vmem>>, %arg5: memref<64x8xf32, #tpu.memory_space<vmem>>) attributes {dimension_semantics = [#tpu.dimension_semantics<parallel>, #tpu.dimension_semantics<arbitrary>], iteration_bounds = array<i64: 2, 1>, scalar_prefetch = 0 : i64, scratch_operands = 0 : i64, tpu.core_type = #tpu.core_type<tc>, window_params = [{transform_indices = @transform_0, window_bounds = array<i64: 64, 32>}, {transform_indices = @transform_1, window_bounds = array<i64: 8, 32>}, {pipeline_mode = #tpu.pipeline_mode<synchronous>, transform_indices = @transform_2, window_bounds = array<i64: 1, 8>}, {transform_indices = @transform_3, window_bounds = array<i64: 64, 8>}]} {
    %c0 = arith.constant 0 : index
    %c0_0 = arith.constant 0 : index
    %0 = vector.load %arg2[%c0, %c0_0] : memref<64x32xf32, #tpu.memory_space<vmem>>, vector<64x32xf32>
    %c0_1 = arith.constant 0 : index
    %c0_2 = arith.constant 0 : index
    %1 = vector.load %arg3[%c0_1, %c0_2] : memref<8x32xf32, #tpu.memory_space<vmem>>, vector<8x32xf32>
    %cst = arith.constant dense<0.000000e+00> : vector<64x8xf32>
    %2 = tpu.matmul %0, %1, %cst {dimension_numbers = #tpu.dot_dimension_numbers<[1], [1], [0], [0], [0, 0, 1, 0], [], []>} : vector<64x32xf32>, vector<8x32xf32>, vector<64x8xf32> -> vector<64x8xf32>
    %c0_3 = arith.constant 0 : index
    %c0_4 = arith.constant 0 : index
    %3 = vector.load %arg4[%c0_3, %c0_4] : memref<1x8xf32, #tpu.memory_space<vmem>>, vector<1x8xf32>
    %4 = vector.broadcast %3 : vector<1x8xf32> to vector<64x8xf32>
    %5 = arith.addf %2, %4 : vector<64x8xf32>
    %c0_5 = arith.constant 0 : index
    %c0_6 = arith.constant 0 : index
    %6 = vector.load %arg5[%c0_5, %c0_6] : memref<64x8xf32, #tpu.memory_space<vmem>>, vector<64x8xf32>
    tpu.vector_store %arg5[%c0_5, %c0_6], %5 {strides = array<i32>} : memref<64x8xf32, #tpu.memory_space<vmem>>, vector<64x8xf32>,
    return
  }
  func.func @transform_0(%arg0: i32, %arg1: i32) -> (i32, i32) {
    %c0_i32 = arith.constant 0 : i32
    return %arg0, %arg1 : i32, i32
  }
  func.func @transform_1(%arg0: i32, %arg1: i32) -> (i32, i32) {
    %c0_i32 = arith.constant 0 : i32
    %c0_i32_0 = arith.constant 0 : i32
    return %c0_i32, %arg1 : i32, i32
  }
  func.func @transform_2(%arg0: i32, %arg1: i32) -> (i32, i32) {
    %c0_i32 = arith.constant 0 : i32
    %c0_i32_0 = arith.constant 0 : i32
    %c0_i32_1 = arith.constant 0 : i32
    return %c0_i32, %c0_i32_0 : i32, i32
  }
  func.func @transform_3(%arg0: i32, %arg1: i32) -> (i32, i32) {
    %c0_i32 = arith.constant 0 : i32
    %c0_i32_0 = arith.constant 0 : i32
    return %arg0, %c0_i32 : i32, i32
  }
}

</mosaic_0001>

<bundles_post_ra>
// kernel: tpu_custom_call.1
= control target key start
LH: loop header
LB: loop body
LE: loop exit
PB: predicated region body
PF: predicated region fallthrough
CT: control target
= control target key end

     0   :  { %s570_s12 = smov 0   ;;  %s572_s13 = smov 0   ;;  %s629_s0 = inlined_call_operand.vmem [shape: f32[128,32], index: 0, kind: input, shape index: {}]   ;;  %s630_s1 = inlined_call_operand.vmem [shape: f32[8,32], index: 1, kind: input, shape index: {}]   ;;  %s631_s2 = inlined_call_operand.vmem [shape: f32[1,8], index: 2, kind: input, shape index: {}]   ;;  %s632_s3 = inlined_call_operand.vmem [shape: f32[128,8], index: 3, kind: output, shape index: {}]  }
   0x1   :  { %s574_s14 = smov 0  }
   0x2 LB: > { %s25_s15 = sadd.s32 1, %s544_s13  ;;  %p460_p0 = scmp.ge.s32.totalorder %s548_s14, 1  ;;  %s548_s14 = sphi %s574_s14, %s13_s14   ;;  %s544_s13 = sphi %s572_s13, %s634_s13   ;;  %s540_s12 = sphi %s570_s12, %s633_s12  }
   0x3   : > { %p27_p1 = scmp.ge.s32.totalorder %s25_s15, 2  ;;  %p164_p2 = scmp.lt.s32.totalorder %s548_s14, 3 }
   0x5   : > { %s636_s15 = smov (%p27_p1, %s25_s15), 0  ;;  %p165_p3 = pnand %p460_p0, %p164_p2 }
   0x6   : > { %v222_v0 = vld [vmem:[%s630_s1] sm:$0xff] (!%p165_p3)  ;;  %vm230_vm0 = vcmask (!%p165_p3), 261120   ;;  %s461_s18 = sshll.u32 (!%p165_p3), %s540_s12, 3  ;;  %vm363_vm1 = vcmask (!%p165_p3), 64512  }
   0x7   : > { %168 = sbr.rel (%p165_p3) target bundleno = 240 (0xf0), region = 32  ;;  %486 = vmatprep.subr.msk.mxu0 (!%p165_p3), %vm230_vm0, %v222_v0  ;;  %500 = vmatprep.subr.msk.mxu1 (!%p165_p3), %vm230_vm0, %v222_v0  ;;  %p196_p4 = scmp.lt.s32.totalorder (!%p165_p3), %s461_s18, 15  ;;  %v465_v9 = vld [vmem:[%s631_s2] ss:$0 sm:$0xff] (!%p165_p3) }
   0x8   : > { %487 = vmatpush3.xpose.msk.msra.mxu0 (!%p165_p3), %vm230_vm0, %v222_v0  ;;  %501 = vmatpush3.xpose.msk.msra.mxu1 (!%p165_p3), %vm230_vm0, %v222_v0 }
   0xe   : > { %s638_s18 = smov (!%p196_p4, %s461_s18), 15 }
   0xf   : > { %s462_s19 = sshll.u32 %s638_s18, 3 }
  0x10   : > { %s202_s22 = scalar_lea.vmem %s629_s0, %s462_s19  ;;  %s212_s27 = scalar_lea.vmem %s632_s3, %s462_s19 }
  0x11   : > { %v214_v1 = vld [vmem:[%s202_s22] sm:$0xff]  ;;  %v215_v3 = vld [vmem:[%s202_s22 + $0x8] sm:$0xff]  ;;  %v216_v5 = vld [vmem:[%s202_s22 + $0x10] sm:$0xff] }
  0x12   : > { %v218_v2 = vld [vmem:[%s202_s22 + $0x20] sm:$0xff]  ;;  %488 = vmatprep.mubr.msk.f32.mxu0 %vm230_vm0, %v214_v1  ;;  %v219_v4 = vld [vmem:[%s202_s22 + $0x28] sm:$0xff]  ;;  %v220_v6 = vld [vmem:[%s202_s22 + $0x30] sm:$0xff] }
  0x13   : > { %494 = vmatprep.mubr.msk.f32.mxu1 %vm230_vm0, %v218_v2  ;;  %489 = vmatmul.mubr.msk.f32.vlgmr.msra.gmra.mrb[0].mxu0 %vm230_vm0, %v215_v3  ;;  %v217_v7 = vld [vmem:[%s202_s22 + $0x18] sm:$0xff] }
  0x14   : > { %495 = vmatmul.mubr.msk.f32.vlgmr.msra.gmra.mrb[0].mxu1 %vm230_vm0, %v219_v4  ;;  %491 = vmatprep.mubr.msk.f32.mxu0 %vm230_vm0, %v216_v5  ;;  %v221_v8 = vld [vmem:[%s202_s22 + $0x38] sm:$0xff] }
  0x15   : > { %497 = vmatprep.mubr.msk.f32.mxu1 %vm230_vm0, %v220_v6 }
  0x17   : > { %492 = vmatmul.mubr.msk.f32.gmra.mrb[2].mxu0 %vm230_vm0, %v217_v7 }
  0x18   : > { %498 = vmatmul.mubr.msk.f32.gmra.mrb[2].mxu1 %vm230_vm0, %v221_v8 }
  0xe6   : > { %v490_v10 = vpop.f32.mrb[0].mxu0 }
  0xe7   : > { %v496_v11 = vpop.f32.mrb[0].mxu1  ;;  %v330_v12 = vadd.f32 %v490_v10, %v465_v9  ;;  %v324_v14 = vpop.f32.mrb[1].mxu0 }
  0xe8   : > { %v350_v13 = vadd.f32 %v496_v11, %v465_v9  ;;  %v344_v15 = vpop.f32.mrb[1].mxu1  ;;  %v325_v16 = vadd.f32 %v465_v9, %v324_v14 }
  0xe9   : > { %v345_v17 = vadd.f32 %v465_v9, %v344_v15  ;;  %365 = vst.msk [vmem:[%s212_s27 + $0x8] sm:$0xff] %vm363_vm1, %v330_v12 }
  0xea   : > { %369 = vst.msk [vmem:[%s212_s27 + $0x28] sm:$0xff] %vm363_vm1, %v350_v13  ;;  %364 = vst.msk [vmem:[%s212_s27] sm:$0xff] %vm363_vm1, %v325_v16  ;;  %v493_v18 = vpop.f32.mrb[2].mxu0 }
  0xeb   : > { %368 = vst.msk [vmem:[%s212_s27 + $0x20] sm:$0xff] %vm363_vm1, %v345_v17  ;;  %v499_v19 = vpop.f32.mrb[2].mxu1  ;;  %v340_v20 = vadd.f32 %v493_v18, %v465_v9  ;;  %v334_v22 = vpop.f32.mrb[3].mxu0 }
  0xec   : > { %v360_v21 = vadd.f32 %v499_v19, %v465_v9  ;;  %v354_v23 = vpop.f32.mrb[3].mxu1  ;;  %v335_v24 = vadd.f32 %v465_v9, %v334_v22 }
  0xed   : > { %v355_v25 = vadd.f32 %v465_v9, %v354_v23  ;;  %367 = vst.msk [vmem:[%s212_s27 + $0x18] sm:$0xff] %vm363_vm1, %v340_v20 }
  0xee   : > { %371 = vst.msk [vmem:[%s212_s27 + $0x38] sm:$0xff] %vm363_vm1, %v360_v21  ;;  %366 = vst.msk [vmem:[%s212_s27 + $0x10] sm:$0xff] %vm363_vm1, %v335_v24 }
  0xef   : > { %370 = vst.msk [vmem:[%s212_s27 + $0x30] sm:$0xff] %vm363_vm1, %v355_v25 }
  0xf0 PF: > { %s13_s14 = sadd.s32 1, %s548_s14   ;;  %s633_s12 = smov %s544_s13 }
  0xf1   : > { %p10_p5 = scmp.ge.s32.totalorder %s13_s14, 4   ;;  %s634_s13 = smov %s636_s15 }
  0xf3   :  { %12 = sbr.rel (!%p10_p5) target bundleno = 2 (0x2), region = 65 }

</bundles_post_ra>
